<compile_context>
chip_gen: v5e
topology: v5e:2x2
jax: 0.10.0
libtpu: 0.0.40
codegen_flags: <defaults>
</compile_context>

<pallas_src>
import jax
import jax.numpy as jnp
from jax.experimental import pallas as pl
from jax.experimental.pallas import tpu as pltpu


def _coordconv_kernel(x_ref, wc_ref, w3_ref, coord_ref, o_ref):
    # x_ref:     (Bt, C, THW)   batch-block of the NCHW slab (native dtype)
    # wc_ref:    (O, C)         channel part of the 1x1 conv weight
    # w3_ref:    (O, 3)         [w_xx, w_yy, bias] columns, f32
    # coord_ref: (2, THW)       rows: xx_plane, yy_plane (input dtype)
    # o_ref:     (Bt, O, THW)
    w3 = w3_ref[...].astype(jnp.float32)                 # (O, 3)
    coords = coord_ref[...].astype(jnp.float32)          # (2, THW)
    xx = coords[0:1, :]                                   # (1, THW)
    yy = coords[1:2, :]
    # Batch-invariant coordinate + bias plane, computed on the VPU (VALU has
    # slack -- the binding resource here is HBM/DMA).
    cb = w3[:, 0:1] * xx + w3[:, 1:2] * yy + w3[:, 2:3]   # (O, THW) f32

    wc = wc_ref[...]
    for b in range(x_ref.shape[0]):                        # Bt is small/static
        acc = jnp.dot(wc, x_ref[b], preferred_element_type=jnp.float32)
        o_ref[b] = (acc + cb).astype(o_ref.dtype)


def _choose_tiles(B, C, O, HW_pad, in_bytes, out_bytes,
                  max_cols=16384, vmem_budget=20 << 20,
                  target_x_bytes=2 << 20, max_bt=8):
    """Pick (Bt, THW): fat steps that still fit a portable VMEM budget."""

    def step_bytes(bt, thw):
        x_b = bt * C * thw * in_bytes
        o_b = bt * O * thw * out_bytes
        c_b = 2 * thw * in_bytes
        w_b = O * C * in_bytes + O * 3 * 4
        tmp = 2 * O * thw * 4  # f32 cb + per-batch accumulator temporaries
        return 2 * (x_b + o_b + c_b + w_b) + tmp  # inputs/outputs double-buffered

    # Spatial tile: largest multiple of 128 dividing HW_pad, capped by
    # max_cols and by the VMEM budget at Bt=1.
    thw = 128
    d = 128
    while d <= min(HW_pad, max_cols):
        if HW_pad % d == 0 and step_bytes(1, d) <= vmem_budget:
            thw = d
        d += 128

    # Batch block: fatten the step toward ~2 MiB of activation bytes.
    bt = 1
    for cand in range(1, min(B, max_bt) + 1):
        if B % cand != 0:
            continue
        if step_bytes(cand, thw) > vmem_budget:
            break
        bt = cand
        if cand * C * thw * in_bytes >= target_x_bytes:
            break
    return bt, thw


def coordconv_pallas(x_nchw, weight, bias):
    """x_nchw: (B, C, H, W); weight: (O, C+2, 1, 1); bias: (O,)."""
    B, C, H, W = x_nchw.shape
    O = weight.shape[0]
    assert weight.shape == (O, C + 2, 1, 1), weight.shape
    HW = H * W
    HW_pad = ((HW + 127) // 128) * 128

    in_bytes = jnp.dtype(x_nchw.dtype).itemsize
    out_dtype = x_nchw.dtype
    out_bytes = jnp.dtype(out_dtype).itemsize
    Bt, THW = _choose_tiles(B, C, O, HW_pad, in_bytes, out_bytes)
    num_s = HW_pad // THW
    num_b = B // Bt

    # Free reshape: NCHW is already (B, C, H*W) contiguous. Pad lanes to 128.
    x3d = x_nchw.reshape(B, C, HW)
    if HW_pad != HW:
        x3d = jnp.pad(x3d, ((0, 0), (0, 0), (0, HW_pad - HW)))

    # Split the conv weight: channel part feeds the MXU; the two coordinate
    # rows and the bias feed the in-kernel VPU add.
    w_flat = weight.reshape(O, C + 2)
    wc = w_flat[:, :C]                                     # (O, C), native dtype
    w3 = jnp.concatenate(
        [w_flat[:, C:C + 2].astype(jnp.float32),
         bias.astype(jnp.float32)[:, None]], axis=1)       # (O, 3) f32

    # Coordinate planes: xx varies along H (x_dim), yy along W (y_dim), both
    # normalized to [-1, 1]; cast to the input dtype (torch .type_as).
    # Guard H==1 / W==1 (PyTorch would divide by zero -> NaN/Inf there).
    xx = 2.0 * jnp.arange(H, dtype=jnp.float32) / max(H - 1, 1) - 1.0
    yy = 2.0 * jnp.arange(W, dtype=jnp.float32) / max(W - 1, 1) - 1.0
    xx_plane = jnp.broadcast_to(xx[:, None], (H, W)).reshape(HW)
    yy_plane = jnp.broadcast_to(yy[None, :], (H, W)).reshape(HW)
    coords = jnp.stack([xx_plane, yy_plane], axis=0).astype(x_nchw.dtype)
    if HW_pad != HW:
        coords = jnp.pad(coords, ((0, 0), (0, HW_pad - HW)))

    out3d = pl.pallas_call(
        _coordconv_kernel,
        out_shape=jax.ShapeDtypeStruct((B, O, HW_pad), out_dtype),
        # Batch is the innermost (fastest-varying) grid axis so the coordinate
        # tile / weight blocks (indices independent of b) are fetched once per
        # spatial tile, not once per (s, b).
        grid=(num_s, num_b),
        in_specs=[
            pl.BlockSpec((Bt, C, THW), lambda s, b: (b, 0, s)),   # x slab
            pl.BlockSpec((O, C), lambda s, b: (0, 0)),            # wc
            pl.BlockSpec((O, 3), lambda s, b: (0, 0)),            # [wxx|wyy|bias]
            pl.BlockSpec((2, THW), lambda s, b: (0, s)),          # coords
        ],
        out_specs=pl.BlockSpec((Bt, O, THW), lambda s, b: (b, 0, s)),
        compiler_params=pltpu.CompilerParams(
            dimension_semantics=("parallel", "parallel"),
            vmem_limit_bytes=32 << 20),
    )(x3d, wc, w3, coords)

    if HW_pad != HW:
        out3d = out3d[:, :, :HW]
    return out3d.reshape(B, O, H, W)


def coordconv_reference(x, weight, bias):
    """Pure-JAX reference matching the PyTorch module (NCHW, 1x1 conv)."""
    B, C, H, W = x.shape
    ii = 2.0 * jnp.arange(H, dtype=jnp.float32) / max(H - 1, 1) - 1.0
    jj = 2.0 * jnp.arange(W, dtype=jnp.float32) / max(W - 1, 1) - 1.0
    xx = jnp.broadcast_to(ii[None, None, :, None], (B, 1, H, W)).astype(x.dtype)
    yy = jnp.broadcast_to(jj[None, None, None, :], (B, 1, H, W)).astype(x.dtype)
    aug = jnp.concatenate([x, xx, yy], axis=1)
    out = jax.lax.conv_general_dilated(
        aug, weight, window_strides=(1, 1), padding="VALID",
        dimension_numbers=("NCHW", "OIHW", "NCHW"))
    return out + bias[None, :, None, None]


if __name__ == "__main__":
    key = jax.random.PRNGKey(0)

    # Main demo shape: B=2, C=4, H=W=16, out_channels=8 (kernel_size=1).
    B, C, H, W, O = 2, 4, 16, 16, 8
    kx, kw, kb = jax.random.split(key, 3)
    x = jax.random.normal(kx, (B, C, H, W), dtype=jnp.float32)
    weight = jax.random.normal(kw, (O, C + 2, 1, 1), dtype=jnp.float32) * 0.1
    bias = jax.random.normal(kb, (O,), dtype=jnp.float32) * 0.1

    out = jax.block_until_ready(coordconv_pallas(x, weight, bias))
    ref = coordconv_reference(x, weight, bias)
    assert out.shape == (B, O, H, W), out.shape
    assert jnp.allclose(out, ref, atol=1e-5, rtol=1e-5), (
        float(jnp.max(jnp.abs(out - ref))))

    # Ragged spatial size (H*W not a multiple of 128) exercises the pad path.
    B2, C2, H2, W2, O2 = 1, 3, 5, 7, 4
    kx2, kw2, kb2 = jax.random.split(jax.random.PRNGKey(1), 3)
    x2 = jax.random.normal(kx2, (B2, C2, H2, W2), dtype=jnp.float32)
    weight2 = jax.random.normal(kw2, (O2, C2 + 2, 1, 1), dtype=jnp.float32) * 0.1
    bias2 = jax.random.normal(kb2, (O2,), dtype=jnp.float32) * 0.1
    out2 = jax.block_until_ready(coordconv_pallas(x2, weight2, bias2))
    ref2 = coordconv_reference(x2, weight2, bias2)
    assert out2.shape == (B2, O2, H2, W2), out2.shape
    assert jnp.allclose(out2, ref2, atol=1e-5, rtol=1e-5), (
        float(jnp.max(jnp.abs(out2 - ref2))))

    print("KERNEL_OK")
</pallas_src>

<mosaic_0001>
module attributes {stable_mosaic.version = 11 : i64} {
  func.func @_coordconv_kernel(%arg0: i32, %arg1: i32, %arg2: memref<2x4x256xf32, #tpu.memory_space<vmem>>, %arg3: memref<8x4xf32, #tpu.memory_space<vmem>>, %arg4: memref<8x3xf32, #tpu.memory_space<vmem>>, %arg5: memref<2x256xf32, #tpu.memory_space<vmem>>, %arg6: memref<2x8x256xf32, #tpu.memory_space<vmem>>) attributes {dimension_semantics = [#tpu.dimension_semantics<parallel>, #tpu.dimension_semantics<parallel>], iteration_bounds = array<i64: 1, 1>, scalar_prefetch = 0 : i64, scratch_operands = 0 : i64, tpu.core_type = #tpu.core_type<tc>, window_params = [{transform_indices = @transform_0, window_bounds = array<i64: 2, 4, 256>}, {pipeline_mode = #tpu.pipeline_mode<synchronous>, transform_indices = @transform_1, window_bounds = array<i64: 8, 4>}, {pipeline_mode = #tpu.pipeline_mode<synchronous>, transform_indices = @transform_2, window_bounds = array<i64: 8, 3>}, {transform_indices = @transform_3, window_bounds = array<i64: 2, 256>}, {transform_indices = @transform_4, window_bounds = array<i64: 2, 8, 256>}]} {
    %c0 = arith.constant 0 : index
    %c0_0 = arith.constant 0 : index
    %0 = vector.load %arg4[%c0, %c0_0] : memref<8x3xf32, #tpu.memory_space<vmem>>, vector<8x3xf32>
    %c0_1 = arith.constant 0 : index
    %c0_2 = arith.constant 0 : index
    %1 = vector.load %arg5[%c0_1, %c0_2] : memref<2x256xf32, #tpu.memory_space<vmem>>, vector<2x256xf32>
    %2 = vector.extract_strided_slice %1 {offsets = [0, 0], sizes = [1, 256], strides = [1, 1]} : vector<2x256xf32> to vector<1x256xf32>
    %3 = vector.extract_strided_slice %1 {offsets = [1, 0], sizes = [1, 256], strides = [1, 1]} : vector<2x256xf32> to vector<1x256xf32>
    %4 = vector.extract_strided_slice %0 {offsets = [0, 0], sizes = [8, 1], strides = [1, 1]} : vector<8x3xf32> to vector<8x1xf32>
    %5 = vector.broadcast %4 : vector<8x1xf32> to vector<8x256xf32>
    %6 = vector.broadcast %2 : vector<1x256xf32> to vector<8x256xf32>
    %7 = arith.mulf %5, %6 : vector<8x256xf32>
    %8 = vector.extract_strided_slice %0 {offsets = [0, 1], sizes = [8, 1], strides = [1, 1]} : vector<8x3xf32> to vector<8x1xf32>
    %9 = vector.broadcast %8 : vector<8x1xf32> to vector<8x256xf32>
    %10 = vector.broadcast %3 : vector<1x256xf32> to vector<8x256xf32>
    %11 = arith.mulf %9, %10 : vector<8x256xf32>
    %12 = arith.addf %7, %11 : vector<8x256xf32>
    %13 = vector.extract_strided_slice %0 {offsets = [0, 2], sizes = [8, 1], strides = [1, 1]} : vector<8x3xf32> to vector<8x1xf32>
    %14 = vector.broadcast %13 : vector<8x1xf32> to vector<8x256xf32>
    %15 = arith.addf %12, %14 : vector<8x256xf32>
    %c0_3 = arith.constant 0 : index
    %c0_4 = arith.constant 0 : index
    %16 = vector.load %arg3[%c0_3, %c0_4] : memref<8x4xf32, #tpu.memory_space<vmem>>, vector<8x4xf32>
    %c0_5 = arith.constant 0 : index
    %c0_6 = arith.constant 0 : index
    %c0_7 = arith.constant 0 : index
    %17 = vector.load %arg2[%c0_5, %c0_6, %c0_7] : memref<2x4x256xf32, #tpu.memory_space<vmem>>, vector<1x4x256xf32>
    %18 = vector.shape_cast %17 : vector<1x4x256xf32> to vector<4x256xf32>
    %cst = arith.constant dense<0.000000e+00> : vector<8x256xf32>
    %19 = tpu.matmul %16, %18, %cst {dimension_numbers = #tpu.dot_dimension_numbers<[1], [0], [0], [1], [0, 0, 1, 1], [], []>} : vector<8x4xf32>, vector<4x256xf32>, vector<8x256xf32> -> vector<8x256xf32>
    %20 = arith.addf %19, %15 : vector<8x256xf32>
    %c0_8 = arith.constant 0 : index
    %c0_9 = arith.constant 0 : index
    %c0_10 = arith.constant 0 : index
    %21 = vector.load %arg6[%c0_8, %c0_9, %c0_10] : memref<2x8x256xf32, #tpu.memory_space<vmem>>, vector<1x8x256xf32>
    %22 = vector.shape_cast %21 : vector<1x8x256xf32> to vector<8x256xf32>
    %23 = vector.shape_cast %20 : vector<8x256xf32> to vector<1x8x256xf32>
    tpu.vector_store %arg6[%c0_8, %c0_9, %c0_10], %23 {strides = array<i32>} : memref<2x8x256xf32, #tpu.memory_space<vmem>>, vector<1x8x256xf32>,
    %c1 = arith.constant 1 : index
    %c0_11 = arith.constant 0 : index
    %c0_12 = arith.constant 0 : index
    %24 = vector.load %arg2[%c1, %c0_11, %c0_12] : memref<2x4x256xf32, #tpu.memory_space<vmem>>, vector<1x4x256xf32>
    %25 = vector.shape_cast %24 : vector<1x4x256xf32> to vector<4x256xf32>
    %cst_13 = arith.constant dense<0.000000e+00> : vector<8x256xf32>
    %26 = tpu.matmul %16, %25, %cst_13 {dimension_numbers = #tpu.dot_dimension_numbers<[1], [0], [0], [1], [0, 0, 1, 1], [], []>} : vector<8x4xf32>, vector<4x256xf32>, vector<8x256xf32> -> vector<8x256xf32>
    %27 = arith.addf %26, %15 : vector<8x256xf32>
    %c1_14 = arith.constant 1 : index
    %c0_15 = arith.constant 0 : index
    %c0_16 = arith.constant 0 : index
    %28 = vector.load %arg6[%c1_14, %c0_15, %c0_16] : memref<2x8x256xf32, #tpu.memory_space<vmem>>, vector<1x8x256xf32>
    %29 = vector.shape_cast %28 : vector<1x8x256xf32> to vector<8x256xf32>
    %30 = vector.shape_cast %27 : vector<8x256xf32> to vector<1x8x256xf32>
    tpu.vector_store %arg6[%c1_14, %c0_15, %c0_16], %30 {strides = array<i32>} : memref<2x8x256xf32, #tpu.memory_space<vmem>>, vector<1x8x256xf32>,
    return
  }
  func.func @transform_0(%arg0: i32, %arg1: i32) -> (i32, i32, i32) {
    %c0_i32 = arith.constant 0 : i32
    %c0_i32_0 = arith.constant 0 : i32
    return %arg1, %c0_i32, %arg0 : i32, i32, i32
  }
  func.func @transform_1(%arg0: i32, %arg1: i32) -> (i32, i32) {
    %c0_i32 = arith.constant 0 : i32
    %c0_i32_0 = arith.constant 0 : i32
    %c0_i32_1 = arith.constant 0 : i32
    return %c0_i32, %c0_i32_0 : i32, i32
  }
  func.func @transform_2(%arg0: i32, %arg1: i32) -> (i32, i32) {
    %c0_i32 = arith.constant 0 : i32
    %c0_i32_0 = arith.constant 0 : i32
    %c0_i32_1 = arith.constant 0 : i32
    return %c0_i32, %c0_i32_0 : i32, i32
  }
  func.func @transform_3(%arg0: i32, %arg1: i32) -> (i32, i32) {
    %c0_i32 = arith.constant 0 : i32
    %c0_i32_0 = arith.constant 0 : i32
    return %c0_i32, %arg0 : i32, i32
  }
  func.func @transform_4(%arg0: i32, %arg1: i32) -> (i32, i32, i32) {
    %c0_i32 = arith.constant 0 : i32
    %c0_i32_0 = arith.constant 0 : i32
    return %arg1, %c0_i32, %arg0 : i32, i32, i32
  }
}

</mosaic_0001>

<bundles_post_ra>
// kernel: tpu_custom_call.1
= control target key start
LH: loop header
LB: loop body
LE: loop exit
PB: predicated region body
PF: predicated region fallthrough
CT: control target
= control target key end

     0   :  { %v227_v2 = vmov 0   ;;  %v228_v3 = vmov 2   ;;  %s284_s0 = inlined_call_operand.vmem [shape: f32[2,4,256], index: 0, kind: input, shape index: {}]   ;;  %s285_s1 = inlined_call_operand.vmem [shape: f32[8,4], index: 1, kind: input, shape index: {}]   ;;  %s286_s2 = inlined_call_operand.vmem [shape: f32[8,3], index: 2, kind: input, shape index: {}]   ;;  %s287_s3 = inlined_call_operand.vmem [shape: f32[2,256], index: 3, kind: input, shape index: {}]   ;;  %s288_s4 = inlined_call_operand.hbm [shape: f32[2,8,256], index: 4, kind: output, shape index: {}]  }
   0x1   :  { %v18_v0 = vld [vmem:[%s286_s2] sm:$0xff]  ;;  %197 = vset.pattern.permute.xlu0 %v227_v2  ;;  %199 = vset.pattern.permute.xlu1 %v228_v3 }
   0x2   :  { %v55_v1 = vld [vmem:[%s284_s0] sm:$0xff]  ;;  %22 = vperm.xlu0 %197, %v18_v0  }
   0x3   :  { %57 = vst [vmem:[#allocation1] ss:$2 sm:$0xff] %v55_v1 }
   0x4   :  { %9 = vsyncpa [#allocation3], 0  ;;  %49 = vperm.xlu1 %199, %v18_v0   ;;  %vm64_vm0 = vcmask 1043456   ;;  %v186_v4 = vld [vmem:[%s284_s0 + $0x8] sm:$0xff]  ;;  %v54_v5 = vld [vmem:[%s285_s1] sm:$0xff]  ;;  %vm60_vm1 = vcmask 31744  }
   0x5   :  { %v229_v8 = vmov 1   ;;  %v19_v11 = vld [vmem:[%s287_s3] sm:$0xf]  ;;  %s230_s2 = smov [#allocation2]   ;;  %s170_s25 = sshll.u32 %s288_s4, 4  ;;  %s171_s25 = int_to_ptr.hbm [resolvable:$true] %s170_s25 }
   0x6   :  { %v26_v13 = vperm.slane %v19_v11, 0  ;;  %v27_v14 = vperm.slane %v19_v11, 2  ;;  %v38_v15 = vperm.slane %v19_v11, 1  ;;  %v39_v16 = vperm.slane %v19_v11, 3  ;;  %s168_s3 = sshll.u32 %s230_s2, 4  ;;  %s231_s26 = smov 256   ;;  %s169_s3 = int_to_ptr.vmem [resolvable:$true] %s168_s3 }
   0x7   :  { %s232_s27 = smov 16  }
   0x8   :  { %v30_v17 = vperm.slane %v26_v13, 0  ;;  %v31_v18 = vperm.slane %v27_v14, 0  ;;  %v42_v19 = vperm.slane %v38_v15, 1  ;;  %v43_v20 = vperm.slane %v39_v16, 1 }
   0xa   :  { %v58_v6 = vld.sshfl [vmem:[#allocation1] sm:$0xff pattern:$0x75316420]  ;;  %v59_v7 = vld.sshfl [vmem:[#allocation1 + $0x8] sm:$0xff pattern:$0x75316420]  ;;  %198 = vset.pattern.permute.xlu0 %v229_v8 }
   0xb   :  { %182 = vmatpush.msk.msra.mxu0 %vm64_vm0, %v58_v6  ;;  %184 = vmatpush.msk.msra.mxu1 %vm64_vm0, %v59_v7  ;;  %114 = vst [vmem:[#allocation1] ss:$2 sm:$0xff] %v186_v4 }
   0xc   :  { %183 = vmatmul.msk.f32.vlgmr.msra.gmra.mxu0 %vm60_vm1, %v54_v5  ;;  %185 = vmatmul.msk.f32.vlgmr.msra.gmra.mxu1 %vm60_vm1, %v54_v5 }
   0xd   :  { %35 = vperm.xlu0 %198, %v18_v0  }
  0x12   :  { %v115_v9 = vld.sshfl [vmem:[#allocation1] sm:$0xff pattern:$0x75316420]  ;;  %v116_v10 = vld.sshfl [vmem:[#allocation1 + $0x8] sm:$0xff pattern:$0x75316420] }
  0x13   :  { %187 = vmatpush.msk.msra.mxu2 %vm64_vm0, %v115_v9  ;;  %189 = vmatpush.msk.msra.mxu3 %vm64_vm0, %v116_v10 }
  0x14   :  { %188 = vmatmul.msk.f32.vlgmr.msra.gmra.mxu2 %vm60_vm1, %v54_v5  ;;  %190 = vmatmul.msk.f32.vlgmr.msra.gmra.mxu3 %vm60_vm1, %v54_v5 }
  0x15   :  { %200 = vset.pattern.permute.xlu0 %v228_v3 }
  0x74   :  { %v23_v12 = vpop.permute.xlu0 %22 }
  0x75   :  { %v32_v21 = vmul.f32 %v30_v17, %v23_v12  ;;  %v33_v22 = vmul.f32 %v31_v18, %v23_v12 }
  0x76   :  { %v50_v26 = vpop.permute.xlu1 %49 }
  0x7f   :  { %v36_v23 = vpop.permute.xlu0 %35 }
  0x80   :  { %v44_v24 = vmul.f32 %v42_v19, %v36_v23  ;;  %v45_v25 = vmul.f32 %v43_v20, %v36_v23 }
  0x82   :  { %v46_v27 = vadd.f32 %v44_v24, %v32_v21  ;;  %v47_v28 = vadd.f32 %v45_v25, %v33_v22 }
  0x84   :  { %v52_v29 = vadd.f32 %v50_v26, %v46_v27  ;;  %v53_v30 = vadd.f32 %v50_v26, %v47_v28 }
  0x89   :  { %v86_v31 = vpop.f32.mrf.mxu0  ;;  %v106_v32 = vpop.f32.mrf.mxu1 }
  0x8a   :  { %v87_v33 = vadd.f32 %v86_v31, %v52_v29  ;;  %v107_v34 = vadd.f32 %v106_v32, %v53_v30 }
  0x8c   :  { %109 = vst [vmem:[#allocation2] sm:$0xff] %v87_v33 }
  0x8d   :  { %110 = vst [vmem:[#allocation2 + $0x8] sm:$0xff] %v107_v34 }
  0x97   :  { %v138_v35 = vpop.f32.mrf.mxu2  ;;  %v158_v36 = vpop.f32.mrf.mxu3 }
  0x98   :  { %v139_v37 = vadd.f32 %v138_v35, %v52_v29  ;;  %v159_v38 = vadd.f32 %v158_v36, %v53_v30 }
  0x9a   :  { %162 = vst [vmem:[#allocation2 + $0x10] sm:$0xff] %v139_v37 }
  0x9b   :  { %163 = vst [vmem:[#allocation2 + $0x18] sm:$0xff] %v159_v38 }
  0x9c   :  { %176 = dma.vmem_to_hbm [thread:$0]  %s169_s3, 512, %s171_s25, [#allocation3], %s231_s26, %s231_s26, %s232_s27  }
  0x9d   :  { %225 = dma.done.wait [#allocation3], 512  }
  0x9e   :  { %226 = vsyncadd [#allocation3], 4294966784 }
  0x9f   :  { %181 = vsyncpa [#allocation3], 1 }

</bundles_post_ra>
